<compile_context>
chip_gen: v5e
topology: v5e:2x2
jax: 0.10.0
libtpu: 0.0.40
codegen_flags: <defaults>
</compile_context>

<pallas_src>
import functools

import jax
import jax.numpy as jnp
from jax import lax
from jax.experimental import pallas as pl
from jax.experimental.pallas import tpu as pltpu

# Deterministic config (CONFIG_SUPERNET['loss'] defaults from the FBNet repo).
ALPHA = 0.2
BETA = 0.6


def _round_up(x, m):
    return (x + m - 1) // m * m


def _ce_partial_kernel(logits_ref, targets_ref, partial_ref, *, tile_n, n_true,
                       ragged):
    """Partial cross-entropy sum over the rows of one batch tile.

    logits_ref : VMEM [tile_n, C]   native dtype (f32/bf16)
    targets_ref: VMEM [tile_n, 1]   int32
    partial_ref: VMEM [1, 8, 128]   f32 (tile partial sum, broadcast over block)
    """
    x = logits_ref[...]                                    # [tn, C] native
    t = targets_ref[...]                                   # [tn, 1] int32
    tn, c = x.shape

    # Row max in the native dtype (exact: max of representable values).
    row_max = jnp.max(x, axis=-1, keepdims=True)           # [tn, 1] native
    row_max_f = row_max.astype(jnp.float32)

    # Target logit picked in native dtype (exact: exactly one non-zero per row),
    # no materialized one-hot.
    col_ids = lax.broadcasted_iota(jnp.int32, (tn, c), 1)
    tgt_logit = jnp.sum(
        jnp.where(col_ids == t, x, jnp.zeros((), x.dtype)),
        axis=-1, keepdims=True).astype(jnp.float32)        # [tn, 1] f32

    # Numerically stable log-sum-exp in f32.
    shifted = x.astype(jnp.float32) - row_max_f            # [tn, C] f32
    lse = jnp.log(jnp.sum(jnp.exp(shifted), axis=-1, keepdims=True))  # [tn, 1]

    # ce = lse - (x_target - row_max)
    ce_row = lse - (tgt_logit - row_max_f)                 # [tn, 1] f32

    ones_blk = jnp.ones(partial_ref.shape, jnp.float32)

    if not ragged:
        # N is a multiple of tile_n: every tile is full, no row mask needed.
        partial_ref[...] = jnp.sum(ce_row) * ones_blk
    else:
        i = pl.program_id(0)
        last = pl.num_programs(0) - 1

        @pl.when(i != last)
        def _():
            partial_ref[...] = jnp.sum(ce_row) * ones_blk

        @pl.when(i == last)          # only the ragged last tile pays for the mask
        def _():
            row_ids = i * tile_n + lax.broadcasted_iota(jnp.int32, (tn, 1), 0)
            masked = jnp.where(row_ids < n_true, ce_row, 0.0)
            partial_ref[...] = jnp.sum(masked) * ones_blk


def _pick_tile(n, c, itemsize):
    """Generation-aware tile-row / scoped-VMEM-limit selection."""
    try:
        vmem_cap = int(pltpu.get_tpu_info().vmem_capacity_bytes)
    except Exception:
        vmem_cap = 128 * 1024 * 1024
    if vmem_cap <= 64 * 1024 * 1024:          # v7x-class: 64 MiB physical VMEM
        budget = 24 * 1024 * 1024
        vmem_limit = 48 * 1024 * 1024
    else:                                      # v5e / v6e: 128 MiB physical VMEM
        budget = 40 * 1024 * 1024
        vmem_limit = 64 * 1024 * 1024
    # Per-row VMEM: 2x double-buffered native logits row + ~3 full-tile f32
    # temporaries (shifted / exp / select) + lane-padded (x,1) int32 targets
    # block (2 buffers x 512 B/row).
    per_row = 2 * c * itemsize + 3 * c * 4 + 2 * 512
    # NOTE: for extremely large C a single 8-row tile may still exceed the
    # budget; tile_n floors at 8 in that (unlikely) case.
    tile_n = budget // per_row
    tile_n = max(8, (tile_n // 8) * 8)
    tile_n = min(tile_n, _round_up(n, 8))
    return tile_n, vmem_limit


def supernet_loss(outs, targets, latency, *, alpha=ALPHA, beta=BETA,
                  tile_rows=None):
    """outs: [N, C] float logits (f32/bf16), targets: [N] int labels, latency: scalar."""
    n, c = outs.shape
    if not jnp.issubdtype(outs.dtype, jnp.floating):
        outs = outs.astype(jnp.float32)
    itemsize = jnp.dtype(outs.dtype).itemsize

    tile_n, vmem_limit = _pick_tile(n, c, itemsize)
    if tile_rows is not None:                 # test/tuning override
        tile_n = max(8, _round_up(min(int(tile_rows), tile_n), 8))

    grid = pl.cdiv(n, tile_n)
    ragged = (n % tile_n) != 0
    targets2d = targets.astype(jnp.int32).reshape(n, 1)

    kernel = functools.partial(_ce_partial_kernel, tile_n=tile_n, n_true=n,
                               ragged=ragged)
    partials = pl.pallas_call(
        kernel,
        out_shape=jax.ShapeDtypeStruct((grid, 8, 128), jnp.float32),
        grid_spec=pltpu.PrefetchScalarGridSpec(
            num_scalar_prefetch=0,
            grid=(grid,),
            in_specs=[
                # logits tile: last block dim == full C (no host-side class pad)
                pl.BlockSpec((tile_n, c), lambda i: (i, 0)),
                # targets tile
                pl.BlockSpec((tile_n, 1), lambda i: (i, 0)),
            ],
            out_specs=pl.BlockSpec((1, 8, 128), lambda i: (i, 0, 0)),
        ),
        compiler_params=pltpu.CompilerParams(
            dimension_semantics=("parallel",),     # megacore-shardable on v7x
            vmem_limit_bytes=vmem_limit,
        ),
    )(outs, targets2d)

    # Tiny scalar epilogue: final reduce + latency scaling (grid is small now
    # that tiles are VMEM-budget sized, so this is negligible).
    ce = jnp.sum(partials[:, 0, 0]) / jnp.float32(n)
    # No guard on latency <= 0 (log -> NaN/-inf), matching the PyTorch reference.
    lat = beta * jnp.log(jnp.asarray(latency, jnp.float32))   # log(latency ** beta)
    return alpha * ce * lat


def _reference(outs, targets, latency, alpha=ALPHA, beta=BETA):
    logp = jax.nn.log_softmax(outs.astype(jnp.float32), axis=-1)
    ce = -jnp.mean(
        jnp.take_along_axis(logp, targets[:, None].astype(jnp.int32), axis=-1))
    lat = beta * jnp.log(jnp.float32(latency))
    return alpha * ce * lat


if __name__ == "__main__":
    key = jax.random.PRNGKey(0)
    k1, k2, k3, k4, k5, k6 = jax.random.split(key, 6)

    # Test 1: small aligned-ish shapes, f32 logits, single full tile.
    N, C = 8, 32
    outs = jax.random.normal(k1, (N, C), dtype=jnp.float32)
    targets = jax.random.randint(k2, (N,), 0, C, dtype=jnp.int32)
    latency = jnp.float32(2.5)

    loss = supernet_loss(outs, targets, latency)
    jax.block_until_ready(loss)
    ref = _reference(outs, targets, latency)
    assert jnp.allclose(loss, ref, rtol=1e-5, atol=1e-5), (loss, ref)

    # Test 2: ragged N, unaligned C (no host padding anywhere), bf16 logits fed
    # directly (no host-side f32 upcast).
    N2, C2 = 13, 40
    outs2 = jax.random.normal(k3, (N2, C2), dtype=jnp.float32).astype(jnp.bfloat16)
    targets2 = jax.random.randint(k4, (N2,), 0, C2, dtype=jnp.int32)
    latency2 = jnp.float32(7.0)

    loss2 = supernet_loss(outs2, targets2, latency2)
    jax.block_until_ready(loss2)
    ref2 = _reference(outs2, targets2, latency2)
    assert jnp.allclose(loss2, ref2, rtol=1e-4, atol=1e-4), (loss2, ref2)

    # Test 3: forced multi-tile grid with a ragged last tile (exercises the
    # pl.when last-step row mask and the partial-sum accumulation path).
    N3, C3 = 20, 40
    outs3 = jax.random.normal(k5, (N3, C3), dtype=jnp.float32)
    targets3 = jax.random.randint(k6, (N3,), 0, C3, dtype=jnp.int32)
    latency3 = jnp.float32(3.0)

    loss3 = supernet_loss(outs3, targets3, latency3, tile_rows=8)
    jax.block_until_ready(loss3)
    ref3 = _reference(outs3, targets3, latency3)
    assert jnp.allclose(loss3, ref3, rtol=1e-5, atol=1e-5), (loss3, ref3)

    print("KERNEL_OK")
</pallas_src>

<mosaic_0001>
module attributes {stable_mosaic.version = 11 : i64} {
  func.func @_ce_partial_kernel(%arg0: i32, %arg1: memref<8x32xf32, #tpu.memory_space<vmem>>, %arg2: memref<8x1xi32, #tpu.memory_space<vmem>>, %arg3: memref<1x8x128xf32, #tpu.memory_space<vmem>>) attributes {dimension_semantics = [#tpu.dimension_semantics<parallel>], iteration_bounds = array<i64: 1>, scalar_prefetch = 0 : i64, scratch_operands = 0 : i64, tpu.core_type = #tpu.core_type<tc>, window_params = [{transform_indices = @transform_0, window_bounds = array<i64: 8, 32>}, {transform_indices = @transform_1, window_bounds = array<i64: 8, 1>}, {transform_indices = @transform_2, window_bounds = array<i64: 1, 8, 128>}]} {
    %c0 = arith.constant 0 : index
    %c0_0 = arith.constant 0 : index
    %0 = vector.load %arg1[%c0, %c0_0] : memref<8x32xf32, #tpu.memory_space<vmem>>, vector<8x32xf32>
    %c0_1 = arith.constant 0 : index
    %c0_2 = arith.constant 0 : index
    %1 = vector.load %arg2[%c0_1, %c0_2] : memref<8x1xi32, #tpu.memory_space<vmem>>, vector<8x1xi32>
    %cst = arith.constant dense<0xFF800000> : vector<8xf32>
    %2 = vector.multi_reduction <maximumf>, %0, %cst [1] : vector<8x32xf32> to vector<8xf32>
    %3 = vector.shape_cast %2 : vector<8xf32> to vector<8x1xf32>
    %4 = tpu.iota {dimensions = array<i32: 1>} : vector<8x32xi32>
    %5 = vector.broadcast %1 : vector<8x1xi32> to vector<8x32xi32>
    %6 = arith.cmpi eq, %4, %5 : vector<8x32xi32>
    %cst_3 = arith.constant 0.000000e+00 : f32
    %7 = vector.broadcast %cst_3 : f32 to vector<8x32xf32>
    %8 = arith.select %6, %0, %7 : vector<8x32xi1>, vector<8x32xf32>
    %cst_4 = arith.constant dense<0.000000e+00> : vector<8xf32>
    %9 = vector.multi_reduction <add>, %8, %cst_4 [1] : vector<8x32xf32> to vector<8xf32>
    %10 = vector.shape_cast %9 : vector<8xf32> to vector<8x1xf32>
    %11 = vector.broadcast %3 : vector<8x1xf32> to vector<8x32xf32>
    %12 = arith.subf %0, %11 : vector<8x32xf32>
    %13 = math.exp %12 : vector<8x32xf32>
    %cst_5 = arith.constant dense<0.000000e+00> : vector<8xf32>
    %14 = vector.multi_reduction <add>, %13, %cst_5 [1] : vector<8x32xf32> to vector<8xf32>
    %15 = vector.shape_cast %14 : vector<8xf32> to vector<8x1xf32>
    %16 = math.log %15 : vector<8x1xf32>
    %17 = arith.subf %10, %3 : vector<8x1xf32>
    %18 = arith.subf %16, %17 : vector<8x1xf32>
    %cst_6 = arith.constant 1.000000e+00 : f32
    %19 = vector.broadcast %cst_6 : f32 to vector<1x8x128xf32>
    %20 = vector.shape_cast %18 : vector<8x1xf32> to vector<1x8x1xf32>
    %cst_7 = arith.constant dense<0.000000e+00> : vector<1xf32>
    %21 = vector.multi_reduction <add>, %20, %cst_7 [1, 2] : vector<1x8x1xf32> to vector<1xf32>
    %22 = vector.shape_cast %21 : vector<1xf32> to vector<1x1x1xf32>
    %23 = vector.extract %22[0, 0, 0] : f32 from vector<1x1x1xf32>
    %24 = vector.broadcast %23 : f32 to vector<1x8x128xf32>
    %25 = arith.mulf %24, %19 : vector<1x8x128xf32>
    %c0_8 = arith.constant 0 : index
    %c0_9 = arith.constant 0 : index
    %c0_10 = arith.constant 0 : index
    %26 = vector.load %arg3[%c0_8, %c0_9, %c0_10] : memref<1x8x128xf32, #tpu.memory_space<vmem>>, vector<1x8x128xf32>
    tpu.vector_store %arg3[%c0_8, %c0_9, %c0_10], %25 {strides = array<i32>} : memref<1x8x128xf32, #tpu.memory_space<vmem>>, vector<1x8x128xf32>,
    return
  }
  func.func @transform_0(%arg0: i32) -> (i32, i32) {
    %c0_i32 = arith.constant 0 : i32
    %c0_i32_0 = arith.constant 0 : i32
    return %arg0, %c0_i32 : i32, i32
  }
  func.func @transform_1(%arg0: i32) -> (i32, i32) {
    %c0_i32 = arith.constant 0 : i32
    %c0_i32_0 = arith.constant 0 : i32
    return %arg0, %c0_i32 : i32, i32
  }
  func.func @transform_2(%arg0: i32) -> (i32, i32, i32) {
    %c0_i32 = arith.constant 0 : i32
    %c0_i32_0 = arith.constant 0 : i32
    %c0_i32_1 = arith.constant 0 : i32
    return %arg0, %c0_i32, %c0_i32_0 : i32, i32, i32
  }
}

</mosaic_0001>

<bundles_post_ra>
// kernel: tpu_custom_call.1
= control target key start
LH: loop header
LB: loop body
LE: loop exit
PB: predicated region body
PF: predicated region fallthrough
CT: control target
= control target key end

     0   :  { %vm14_vm0 = vcmask 261120   ;;  %s131_s0 = inlined_call_operand.vmem [shape: f32[8,32], index: 0, kind: input, shape index: {}]   ;;  %s132_s1 = inlined_call_operand.vmem [shape: s32[8,1], index: 1, kind: input, shape index: {}]   ;;  %s133_s2 = inlined_call_operand.hbm [shape: f32[1,8,128], index: 2, kind: output, shape index: {}]  }
   0x1   :  { %v12_v0 = vld [vmem:[%s131_s0] sm:$0xff] }
   0x2   :  { %7 = vsyncpa [#allocation3], 0  ;;  %v15_v1 = vsel %vm14_vm0, %v12_v0, -inf  ;;  %v102_v2 = vmov 0   ;;  %v13_v3 = vld [vmem:[%s132_s1] sm:$0xff]  ;;  %v18_v9 = vlaneseq  ;;  %vm38_vm2 = vcmask 7168  }
   0x3   :  { %71 = vset.pattern.permute.xlu0 %v102_v2  ;;  %s103_s0 = smov [#allocation2]   ;;  %s58_s15 = sshll.u32 %s133_s2, 4  ;;  %s59_s15 = int_to_ptr.hbm [resolvable:$true] %s58_s15 }
   0x4   :  { %16 = vmax.xlane.f32.xlu0 %v15_v1  ;;  %v19_v10 = vand.u32 127, %v18_v9  ;;  %s56_s1 = sshll.u32 %s103_s0, 4  ;;  %s57_s1 = int_to_ptr.vmem [resolvable:$true] %s56_s1 }
  0x18   :  { %21 = vperm.xlu0 %71, %v13_v3  }
  0x77   :  { %v17_v4 = vpop.xlane.xlu0 %16 }
  0x78   :  { %v28_v5 = vsub.f32 %v12_v0, %v17_v4 }
  0x7a   :  { %v29_v6 = vmul.f32 1.442695, %v28_v5 }
  0x7c   :  { %72 = vpow2.f32 %v29_v6 }
  0x82   :  { %v73_v7 = vpop.eup %72 }
  0x83   :  { %v31_v8 = vsel %vm14_vm0, %v73_v7, 0.0 }
  0x84   :  { %32 = vadd.xlane.f32.xlu1 %v31_v8 }
  0x8a   :  { %v22_v11 = vpop.permute.xlu0 %21 }
  0x8b   :  { %vm23_vm1 = vcmp.eq.s32.totalorder %v19_v10, %v22_v11 }
  0x8c   :  { %v24_v12 = vsel %vm23_vm1, %v12_v0, 0.0 }
  0x8d   :  { %v25_v13 = vsel %vm14_vm0, %v24_v12, 0.0 }
  0x8e   :  { %26 = vadd.xlane.f32.xlu1 %v25_v13 }
  0xf7   :  { %v33_v14 = vpop.xlane.xlu1 %32 }
  0xf8   :  { %74 = vlog2.f32 %v33_v14 }
  0xfe   :  { %v75_v15 = vpop.eup %74 }
  0xff   :  { %v35_v17 = vmul.f32 0.6931472, %v75_v15 }
 0x101   :  { %v27_v16 = vpop.xlane.xlu1 %26 }
 0x102   :  { %v36_v18 = vsub.f32 %v27_v16, %v17_v4 }
 0x104   :  { %v37_v19 = vsub.f32 %v35_v17, %v36_v18 }
 0x106   :  { %v39_v20 = vsel %vm38_vm2, %v37_v19, 0.0 }
 0x107   :  { %40 = vadd.xlane.f32.xlu2 %v39_v20 }
 0x17a   :  { %v41_v21 = vpop.xlane.xlu2 %40 }
 0x17b   :  { %v42_v22 = vrot.slane %v41_v21, 4 }
 0x17d   :  { %v43_v23 = vadd.f32 %v42_v22, %v41_v21 }
 0x17f   :  { %v44_v24 = vrot.slane %v43_v23, 2 }
 0x181   :  { %v45_v25 = vadd.f32 %v44_v24, %v43_v23 }
 0x183   :  { %v46_v26 = vrot.slane %v45_v25, 1 }
 0x185   :  { %v47_v27 = vadd.f32 %v46_v26, %v45_v25 }
 0x187   :  { %67 = vpush %v47_v27 }
 0x1b8   :  { %s68_s16 = spop %67 }
 0x1b9   :  { %v49_v28 = vstv %s68_s16 }
 0x1ba   :  { %50 = vst [vmem:[#allocation2] sm:$0xff] %v49_v28 }
 0x1bb   :  { %61 = dma.vmem_to_hbm [thread:$0]  %s57_s1, 128, %s59_s15, [#allocation3]  }
 0x1bc   :  { %100 = dma.done.wait [#allocation3], 128  }
 0x1bd   :  { %101 = vsyncadd [#allocation3], 4294967168 }
 0x1be   :  { %66 = vsyncpa [#allocation3], 1 }

</bundles_post_ra>
